<compile_context>
chip_gen: v7x
topology: tpu7x:2x2x1
jax: 0.10.0
libtpu: 0.0.40
codegen_flags: <defaults>
</compile_context>

<pallas_src>
import functools

import jax
import jax.numpy as jnp
import numpy as np
from jax import lax
from jax.experimental import pallas as pl
from jax.experimental.pallas import tpu as pltpu


def _cdiv(a, b):
    return -(-a // b)


def _choose_tiles(T, d, batch, target):
    """Pick (time_tile, halo_width, num_tiles).

    Tiled-path invariants: halo % 128 == 0, halo >= dilation, tile % halo == 0,
    so halo block-index maps stay integral and in-kernel shifts stay lane
    aligned.  Degenerate path (T < 128 or T < halo): one full-extent tile.
    """
    d = max(int(d), 1)
    h = 128 * _cdiv(d, 128)
    if T < 128 or T < h:
        return T, T, 1                       # single full-extent tile
    tT = min(int(target), T)
    # v7x has 2 TensorCores; "parallel" grid axes shard across them, so make
    # sure there are at least 2 grid cells even for batch-1 inputs.
    if batch * _cdiv(T, tT) < 2:
        tT = _cdiv(T, 2)
    tT = max(h, h * (tT // h))               # multiple of halo (hence of 128)
    return tT, h, _cdiv(T, tT)


def _drl_kernel(hl_ref, xc_ref, hr_ref, mask_ref,
                w_cat_ref, b_dil_ref, w_1x1_ref, b_1x1_ref, o_ref, *,
                dilation, tile_t, halo, seq_len, fuse_taps, use_roll,
                operand_dtype):
    """One (batch, time-tile) grid cell. NCT layout: time lives in the lane dim.

    hl_ref : (1, Cin, h)   halo  x[:, t0-h : t0]         (clamped at the start)
    xc_ref : (1, Cin, tT)  centre x[:, t0 : t0+tT],  t0 = t * tT
    hr_ref : (1, Cin, h)   halo  x[:, t0+tT : t0+tT+h]   (clamped at the end)
    mask   : (1, 1, tT)    mask channel 0 (lane dense)
    w_cat  : (Cout, 3*Cin) dilated-conv taps [-d | 0 | +d] concatenated over Cin
    b_dil  : (Cout, 1), w_1x1 : (Cout, Cout), b_1x1 : (Cout, 1)
    o_ref  : (1, Cout, tT)
    """
    d, tT, h, T = dilation, tile_t, halo, seq_len
    t = pl.program_id(1)

    xc = xc_ref[0]                                        # (Cin, tT)
    cin = xc.shape[0]

    if use_roll:
        # Lane-aligned path: shifts via the XLU (pltpu.roll, jnp.roll semantics:
        # result[:, j] = src[:, (j - shift) % n]) + 128-aligned selects/concats.
        hl, hr = hl_ref[0], hr_ref[0]
        col_h = lax.broadcasted_iota(jnp.int32, (1, h), 1)

        # left tap: x[:, g - d]
        rc = pltpu.roll(xc, shift=d % tT, axis=1)
        rh = pltpu.roll(hl, shift=d % h, axis=1)
        head = jnp.where(col_h < d, rh, rc[:, :h])
        left_tap = head if h == tT else jnp.concatenate([head, rc[:, h:]], axis=1)

        # right tap: x[:, g + d]
        rc = pltpu.roll(xc, shift=(tT - d) % tT, axis=1)
        rh = pltpu.roll(hr, shift=(h - d) % h, axis=1)
        tail = jnp.where(col_h >= h - d, rh, rc[:, tT - h:])
        right_tap = tail if h == tT else jnp.concatenate([rc[:, :tT - h], tail], axis=1)
    else:
        # Degenerate single-tile path (very short sequences): build the shifted
        # taps with an explicit zero block; the halo refs are unused.
        dd = min(d, tT)
        if dd == tT:
            left_tap = jnp.zeros_like(xc)
            right_tap = jnp.zeros_like(xc)
        else:
            z = jnp.zeros((cin, dd), xc.dtype)
            left_tap = jnp.concatenate([z, xc[:, :tT - dd]], axis=1)
            right_tap = jnp.concatenate([xc[:, dd:], z], axis=1)

    # Conv1d zero-padding + clamped-halo neutralisation via the global time
    # index (also protects against garbage in partial boundary blocks).  On
    # interior tiles both selects are no-ops; kept unconditional (VPU slack).
    g = t * tT + lax.broadcasted_iota(jnp.int32, (1, tT), 1)
    left_tap = jnp.where(g >= d, left_tap, 0.0)
    right_tap = jnp.where(g + d < T, right_tap, 0.0)

    def cast(v):
        return v if operand_dtype is None else v.astype(operand_dtype)

    w_cat = w_cat_ref[...]
    if fuse_taps:
        # Single K = 3*Cin MXU pass instead of three K = Cin passes.
        x_cat = jnp.concatenate([left_tap, xc, right_tap], axis=0)   # (3*Cin, tT)
        acc = jnp.dot(cast(w_cat), cast(x_cat), preferred_element_type=jnp.float32)
    else:
        acc = jnp.dot(cast(w_cat[:, :cin]), cast(left_tap),
                      preferred_element_type=jnp.float32)
        acc = acc + jnp.dot(cast(w_cat[:, cin:2 * cin]), cast(xc),
                            preferred_element_type=jnp.float32)
        acc = acc + jnp.dot(cast(w_cat[:, 2 * cin:]), cast(right_tap),
                            preferred_element_type=jnp.float32)
    acc = acc + b_dil_ref[...]                                       # (Cout, tT)
    acc = jnp.maximum(acc, 0.0)                                      # ReLU

    out = jnp.dot(cast(w_1x1_ref[...]), cast(acc),
                  preferred_element_type=jnp.float32)
    out = out + b_1x1_ref[...]

    # dropout == identity (inference); residual from the same centre tile,
    # mask channel 0 broadcasts over channels.
    y = (xc + out) * mask_ref[0]
    o_ref[0] = y.astype(o_ref.dtype)


def dilated_residual_layer(x_nct, mask_nct, params, dilation, *,
                           time_tile_target=4096, operand_dtype=None):
    """x_nct: (B, Cin, T) f32, mask_nct: (B, Cm, T) f32. Returns (B, Cout, T).

    operand_dtype: optional lower-precision matmul-operand dtype (e.g.
    jnp.bfloat16) for v6e/v7x MXU rate; accumulation stays float32.  Default
    None keeps full f32 operands (needed for the 1e-5 check below).
    """
    w_dil, b_dil, w_1x1, b_1x1 = (params["w_dil"], params["b_dil"],
                                  params["w_1x1"], params["b_1x1"])
    B, Cin, T = x_nct.shape
    Cout = w_dil.shape[0]
    d = int(dilation)
    assert Cin == Cout, "residual connection requires in_channels == out_channels"

    tT, h, nT = _choose_tiles(T, d, B, time_tile_target)
    if nT > 1:
        assert tT % h == 0 and h >= d and tT >= h
    ratio = tT // h                       # halo blocks per centre tile
    nH = _cdiv(T, h)                      # number of halo-granularity blocks
    use_roll = (tT % 128 == 0) and (h % 128 == 0)
    fuse_taps = (Cin % 8 == 0)            # sublane-aligned channel concat only

    # ---- glue: weight reshaping only (no activation pads / transposes) ----
    # PyTorch Conv1d weight (Cout, Cin, 3): tap k multiplies x[:, g + (k-1)*d].
    w_cat = jnp.concatenate([w_dil[:, :, 0], w_dil[:, :, 1], w_dil[:, :, 2]], axis=1)
    b_dil_c = b_dil.reshape(Cout, 1)
    w_1x1_m = w_1x1[:, :, 0]
    b_1x1_c = b_1x1.reshape(Cout, 1)
    mask_row = mask_nct[:, 0:1, :]        # (B, 1, T)  lane-dense

    kernel = functools.partial(
        _drl_kernel, dilation=d, tile_t=tT, halo=h, seq_len=T,
        fuse_taps=fuse_taps, use_roll=use_roll, operand_dtype=operand_dtype)

    center_map = lambda b, t: (b, 0, t)
    left_map = lambda b, t: (b, 0, jnp.maximum(t * ratio - 1, 0))
    right_map = lambda b, t: (b, 0, jnp.minimum((t + 1) * ratio, nH - 1))

    flops = int(B * T * (2 * Cout * 3 * Cin + 2 * Cout * Cout))
    bytes_accessed = int(4 * (B * Cin * T + 2 * B * Cin * h * nT + 2 * B * T
                              + B * Cout * T + 3 * Cin * Cout + Cout * Cout
                              + 2 * Cout))

    return pl.pallas_call(
        kernel,
        out_shape=jax.ShapeDtypeStruct((B, Cout, T), x_nct.dtype),
        grid_spec=pltpu.PrefetchScalarGridSpec(
            num_scalar_prefetch=0,
            grid=(B, nT),
            in_specs=[
                pl.BlockSpec((1, Cin, h), left_map),                 # x left halo
                pl.BlockSpec((1, Cin, tT), center_map),              # x centre tile
                pl.BlockSpec((1, Cin, h), right_map),                # x right halo
                pl.BlockSpec((1, 1, tT), lambda b, t: (b, 0, t)),    # mask ch 0
                pl.BlockSpec((Cout, 3 * Cin), lambda b, t: (0, 0)),  # w_cat
                pl.BlockSpec((Cout, 1), lambda b, t: (0, 0)),        # b_dil
                pl.BlockSpec((Cout, Cout), lambda b, t: (0, 0)),     # w_1x1
                pl.BlockSpec((Cout, 1), lambda b, t: (0, 0)),        # b_1x1
            ],
            out_specs=pl.BlockSpec((1, Cout, tT), lambda b, t: (b, 0, t)),
        ),
        compiler_params=pltpu.CompilerParams(
            dimension_semantics=("parallel", "parallel"),
            vmem_limit_bytes=32 * 1024 * 1024),
        cost_estimate=pl.CostEstimate(flops=flops, transcendentals=0,
                                      bytes_accessed=bytes_accessed),
    )(x_nct, x_nct, x_nct, mask_row, w_cat, b_dil_c, w_1x1_m, b_1x1_c)


def _reference(x_nct, mask_nct, params, dilation):
    """Pure-JAX reference of the same forward pass (for a sanity check)."""
    w_dil, b_dil, w_1x1, b_1x1 = (params["w_dil"], params["b_dil"],
                                  params["w_1x1"], params["b_1x1"])
    d = int(dilation)
    B, Cin, T = x_nct.shape
    xpad = jnp.pad(x_nct, ((0, 0), (0, 0), (d, d)))               # (B, Cin, T+2d)
    taps = [xpad[:, :, k * d:k * d + T] for k in range(3)]        # each (B, Cin, T)
    h = sum(jnp.einsum("oc,bct->bot", w_dil[:, :, k], taps[k]) for k in range(3))
    h = h + b_dil[None, :, None]
    h = jnp.maximum(h, 0.0)
    out = jnp.einsum("oc,bct->bot", w_1x1[:, :, 0], h) + b_1x1[None, :, None]
    return (x_nct + out) * mask_nct[:, 0:1, :]


if __name__ == "__main__":
    # Residual connection requires in_channels == out_channels.
    configs = [
        # (B, C, T, dilation, time_tile_target)
        (2, 8, 512, 4, 128),    # tiled path: tT=128, h=128, nT=4, fused K=24 dot
        (1, 8, 704, 130, 512),  # d>128 halo (h=256), partial last tile, B=1 balance
        (2, 4, 16, 2, 4096),    # degenerate tiny path (single tile, no roll/fusion)
    ]

    key = jax.random.PRNGKey(0)
    for (B, C, T, dil, target) in configs:
        key, k1, k2, k3, k4, k5, k6 = jax.random.split(key, 7)
        params = {
            "w_dil": jax.random.normal(k1, (C, C, 3), jnp.float32) * 0.1,  # (Cout, Cin, 3)
            "b_dil": jax.random.normal(k2, (C,), jnp.float32) * 0.1,
            "w_1x1": jax.random.normal(k3, (C, C, 1), jnp.float32) * 0.1,  # (Cout, Cout, 1)
            "b_1x1": jax.random.normal(k4, (C,), jnp.float32) * 0.1,
        }
        x = jax.random.normal(k5, (B, C, T), jnp.float32)
        mask = (jax.random.uniform(k6, (B, C, T)) > 0.3).astype(jnp.float32)

        y = dilated_residual_layer(x, mask, params, dil, time_tile_target=target)
        y = jax.block_until_ready(y)

        y_ref = _reference(x, mask, params, dil)
        np.testing.assert_allclose(np.asarray(y), np.asarray(y_ref),
                                   rtol=1e-5, atol=1e-5)

    print("KERNEL_OK")
</pallas_src>

<mosaic_0001>
module attributes {stable_mosaic.version = 11 : i64} {
  func.func @_drl_kernel(%arg0: i32, %arg1: i32, %arg2: memref<1x8x128xf32, #tpu.memory_space<vmem>>, %arg3: memref<1x8x128xf32, #tpu.memory_space<vmem>>, %arg4: memref<1x8x128xf32, #tpu.memory_space<vmem>>, %arg5: memref<1x1x128xf32, #tpu.memory_space<vmem>>, %arg6: memref<8x24xf32, #tpu.memory_space<vmem>>, %arg7: memref<8x1xf32, #tpu.memory_space<vmem>>, %arg8: memref<8x8xf32, #tpu.memory_space<vmem>>, %arg9: memref<8x1xf32, #tpu.memory_space<vmem>>, %arg10: memref<1x8x128xf32, #tpu.memory_space<vmem>>) attributes {dimension_semantics = [#tpu.dimension_semantics<parallel>, #tpu.dimension_semantics<parallel>], iteration_bounds = array<i64: 2, 4>, scalar_prefetch = 0 : i64, scratch_operands = 0 : i64, tpu.core_type = #tpu.core_type<tc>, window_params = [{transform_indices = @transform_0, window_bounds = array<i64: 1, 8, 128>}, {transform_indices = @transform_1, window_bounds = array<i64: 1, 8, 128>}, {transform_indices = @transform_2, window_bounds = array<i64: 1, 8, 128>}, {transform_indices = @transform_3, window_bounds = array<i64: 1, 1, 128>}, {pipeline_mode = #tpu.pipeline_mode<synchronous>, transform_indices = @transform_4, window_bounds = array<i64: 8, 24>}, {pipeline_mode = #tpu.pipeline_mode<synchronous>, transform_indices = @transform_5, window_bounds = array<i64: 8, 1>}, {pipeline_mode = #tpu.pipeline_mode<synchronous>, transform_indices = @transform_6, window_bounds = array<i64: 8, 8>}, {pipeline_mode = #tpu.pipeline_mode<synchronous>, transform_indices = @transform_7, window_bounds = array<i64: 8, 1>}, {transform_indices = @transform_8, window_bounds = array<i64: 1, 8, 128>}]} {
    %c0 = arith.constant 0 : index
    %c0_0 = arith.constant 0 : index
    %c0_1 = arith.constant 0 : index
    %0 = vector.load %arg3[%c0, %c0_0, %c0_1] : memref<1x8x128xf32, #tpu.memory_space<vmem>>, vector<1x8x128xf32>
    %1 = vector.shape_cast %0 : vector<1x8x128xf32> to vector<8x128xf32>
    %c0_2 = arith.constant 0 : index
    %c0_3 = arith.constant 0 : index
    %c0_4 = arith.constant 0 : index
    %2 = vector.load %arg2[%c0_2, %c0_3, %c0_4] : memref<1x8x128xf32, #tpu.memory_space<vmem>>, vector<1x8x128xf32>
    %3 = vector.shape_cast %2 : vector<1x8x128xf32> to vector<8x128xf32>
    %c0_5 = arith.constant 0 : index
    %c0_6 = arith.constant 0 : index
    %c0_7 = arith.constant 0 : index
    %4 = vector.load %arg4[%c0_5, %c0_6, %c0_7] : memref<1x8x128xf32, #tpu.memory_space<vmem>>, vector<1x8x128xf32>
    %5 = vector.shape_cast %4 : vector<1x8x128xf32> to vector<8x128xf32>
    %6 = tpu.iota {dimensions = array<i32: 1>} : vector<1x128xi32>
    %c4_i32 = arith.constant 4 : i32
    %7 = tpu.dynamic_rotate %1 by %c4_i32 dim 1 : vector<8x128xf32>, i32 -> vector<8x128xf32>
    %c4_i32_8 = arith.constant 4 : i32
    %8 = tpu.dynamic_rotate %3 by %c4_i32_8 dim 1 : vector<8x128xf32>, i32 -> vector<8x128xf32>
    %c4_i32_9 = arith.constant 4 : i32
    %9 = vector.broadcast %c4_i32_9 : i32 to vector<1x128xi32>
    %10 = arith.cmpi slt, %6, %9 : vector<1x128xi32>
    %11 = vector.shape_cast %10 : vector<1x128xi1> to vector<1x128xi1>
    %12 = vector.broadcast %11 : vector<1x128xi1> to vector<8x128xi1>
    %13 = arith.select %12, %8, %7 : vector<8x128xi1>, vector<8x128xf32>
    %c124_i32 = arith.constant 124 : i32
    %14 = tpu.dynamic_rotate %1 by %c124_i32 dim 1 : vector<8x128xf32>, i32 -> vector<8x128xf32>
    %c124_i32_10 = arith.constant 124 : i32
    %15 = tpu.dynamic_rotate %5 by %c124_i32_10 dim 1 : vector<8x128xf32>, i32 -> vector<8x128xf32>
    %c124_i32_11 = arith.constant 124 : i32
    %16 = vector.broadcast %c124_i32_11 : i32 to vector<1x128xi32>
    %17 = arith.cmpi sge, %6, %16 : vector<1x128xi32>
    %18 = vector.shape_cast %17 : vector<1x128xi1> to vector<1x128xi1>
    %19 = vector.broadcast %18 : vector<1x128xi1> to vector<8x128xi1>
    %20 = arith.select %19, %15, %14 : vector<8x128xi1>, vector<8x128xf32>
    %c128_i32 = arith.constant 128 : i32
    %21 = arith.muli %arg1, %c128_i32 : i32
    %22 = tpu.iota {dimensions = array<i32: 1>} : vector<1x128xi32>
    %23 = vector.broadcast %21 : i32 to vector<1x128xi32>
    %24 = arith.addi %23, %22 : vector<1x128xi32>
    %c4_i32_12 = arith.constant 4 : i32
    %25 = vector.broadcast %c4_i32_12 : i32 to vector<1x128xi32>
    %26 = arith.cmpi sge, %24, %25 : vector<1x128xi32>
    %cst = arith.constant 0.000000e+00 : f32
    %27 = vector.shape_cast %26 : vector<1x128xi1> to vector<1x128xi1>
    %28 = vector.broadcast %27 : vector<1x128xi1> to vector<8x128xi1>
    %29 = vector.broadcast %cst : f32 to vector<8x128xf32>
    %30 = arith.select %28, %13, %29 : vector<8x128xi1>, vector<8x128xf32>
    %c4_i32_13 = arith.constant 4 : i32
    %31 = vector.broadcast %c4_i32_13 : i32 to vector<1x128xi32>
    %32 = arith.addi %24, %31 : vector<1x128xi32>
    %c512_i32 = arith.constant 512 : i32
    %33 = vector.broadcast %c512_i32 : i32 to vector<1x128xi32>
    %34 = arith.cmpi slt, %32, %33 : vector<1x128xi32>
    %cst_14 = arith.constant 0.000000e+00 : f32
    %35 = vector.shape_cast %34 : vector<1x128xi1> to vector<1x128xi1>
    %36 = vector.broadcast %35 : vector<1x128xi1> to vector<8x128xi1>
    %37 = vector.broadcast %cst_14 : f32 to vector<8x128xf32>
    %38 = arith.select %36, %20, %37 : vector<8x128xi1>, vector<8x128xf32>
    %c0_15 = arith.constant 0 : index
    %c0_16 = arith.constant 0 : index
    %39 = vector.load %arg6[%c0_15, %c0_16] : memref<8x24xf32, #tpu.memory_space<vmem>>, vector<8x24xf32>
    %40 = tpu.concatenate %30, %1, %38 in 0 : vector<8x128xf32>, vector<8x128xf32>, vector<8x128xf32> -> vector<24x128xf32>
    %cst_17 = arith.constant dense<0.000000e+00> : vector<8x128xf32>
    %41 = tpu.matmul %39, %40, %cst_17 {dimension_numbers = #tpu.dot_dimension_numbers<[1], [0], [0], [1], [0, 0, 1, 1], [], []>} : vector<8x24xf32>, vector<24x128xf32>, vector<8x128xf32> -> vector<8x128xf32>
    %c0_18 = arith.constant 0 : index
    %c0_19 = arith.constant 0 : index
    %42 = vector.load %arg7[%c0_18, %c0_19] : memref<8x1xf32, #tpu.memory_space<vmem>>, vector<8x1xf32>
    %43 = vector.broadcast %42 : vector<8x1xf32> to vector<8x128xf32>
    %44 = arith.addf %41, %43 : vector<8x128xf32>
    %cst_20 = arith.constant 0.000000e+00 : f32
    %45 = vector.broadcast %cst_20 : f32 to vector<8x128xf32>
    %46 = arith.maximumf %44, %45 : vector<8x128xf32>
    %c0_21 = arith.constant 0 : index
    %c0_22 = arith.constant 0 : index
    %47 = vector.load %arg8[%c0_21, %c0_22] : memref<8x8xf32, #tpu.memory_space<vmem>>, vector<8x8xf32>
    %cst_23 = arith.constant dense<0.000000e+00> : vector<8x128xf32>
    %48 = tpu.matmul %47, %46, %cst_23 {dimension_numbers = #tpu.dot_dimension_numbers<[1], [0], [0], [1], [0, 0, 1, 1], [], []>} : vector<8x8xf32>, vector<8x128xf32>, vector<8x128xf32> -> vector<8x128xf32>
    %c0_24 = arith.constant 0 : index
    %c0_25 = arith.constant 0 : index
    %49 = vector.load %arg9[%c0_24, %c0_25] : memref<8x1xf32, #tpu.memory_space<vmem>>, vector<8x1xf32>
    %50 = vector.broadcast %49 : vector<8x1xf32> to vector<8x128xf32>
    %51 = arith.addf %48, %50 : vector<8x128xf32>
    %52 = arith.addf %1, %51 : vector<8x128xf32>
    %c0_26 = arith.constant 0 : index
    %c0_27 = arith.constant 0 : index
    %c0_28 = arith.constant 0 : index
    %53 = vector.load %arg5[%c0_26, %c0_27, %c0_28] : memref<1x1x128xf32, #tpu.memory_space<vmem>>, vector<1x1x128xf32>
    %54 = vector.shape_cast %53 : vector<1x1x128xf32> to vector<1x128xf32>
    %55 = vector.broadcast %54 : vector<1x128xf32> to vector<8x128xf32>
    %56 = arith.mulf %52, %55 : vector<8x128xf32>
    %c0_29 = arith.constant 0 : index
    %c0_30 = arith.constant 0 : index
    %c0_31 = arith.constant 0 : index
    %57 = vector.load %arg10[%c0_29, %c0_30, %c0_31] : memref<1x8x128xf32, #tpu.memory_space<vmem>>, vector<1x8x128xf32>
    %58 = vector.shape_cast %57 : vector<1x8x128xf32> to vector<8x128xf32>
    %59 = vector.shape_cast %56 : vector<8x128xf32> to vector<1x8x128xf32>
    tpu.vector_store %arg10[%c0_29, %c0_30, %c0_31], %59 {strides = array<i32>} : memref<1x8x128xf32, #tpu.memory_space<vmem>>, vector<1x8x128xf32>,
    return
  }
  func.func @transform_0(%arg0: i32, %arg1: i32) -> (i32, i32, i32) {
    %c1_i32 = arith.constant 1 : i32
    %0 = arith.muli %arg1, %c1_i32 : i32
    %c1_i32_0 = arith.constant 1 : i32
    %1 = arith.subi %0, %c1_i32_0 : i32
    %c0_i32 = arith.constant 0 : i32
    %2 = arith.maxsi %1, %c0_i32 : i32
    %c0_i32_1 = arith.constant 0 : i32
    %c0_i32_2 = arith.constant 0 : i32
    return %arg0, %c0_i32_1, %2 : i32, i32, i32
  }
  func.func @transform_1(%arg0: i32, %arg1: i32) -> (i32, i32, i32) {
    %c0_i32 = arith.constant 0 : i32
    %c0_i32_0 = arith.constant 0 : i32
    return %arg0, %c0_i32, %arg1 : i32, i32, i32
  }
  func.func @transform_2(%arg0: i32, %arg1: i32) -> (i32, i32, i32) {
    %c1_i32 = arith.constant 1 : i32
    %0 = arith.addi %arg1, %c1_i32 : i32
    %c1_i32_0 = arith.constant 1 : i32
    %1 = arith.muli %0, %c1_i32_0 : i32
    %c3_i32 = arith.constant 3 : i32
    %2 = arith.minsi %1, %c3_i32 : i32
    %c0_i32 = arith.constant 0 : i32
    %c0_i32_1 = arith.constant 0 : i32
    return %arg0, %c0_i32, %2 : i32, i32, i32
  }
  func.func @transform_3(%arg0: i32, %arg1: i32) -> (i32, i32, i32) {
    %c0_i32 = arith.constant 0 : i32
    %c0_i32_0 = arith.constant 0 : i32
    return %arg0, %c0_i32, %arg1 : i32, i32, i32
  }
  func.func @transform_4(%arg0: i32, %arg1: i32) -> (i32, i32) {
    %c0_i32 = arith.constant 0 : i32
    %c0_i32_0 = arith.constant 0 : i32
    %c0_i32_1 = arith.constant 0 : i32
    return %c0_i32, %c0_i32_0 : i32, i32
  }
  func.func @transform_5(%arg0: i32, %arg1: i32) -> (i32, i32) {
    %c0_i32 = arith.constant 0 : i32
    %c0_i32_0 = arith.constant 0 : i32
    %c0_i32_1 = arith.constant 0 : i32
    return %c0_i32, %c0_i32_0 : i32, i32
  }
  func.func @transform_6(%arg0: i32, %arg1: i32) -> (i32, i32) {
    %c0_i32 = arith.constant 0 : i32
    %c0_i32_0 = arith.constant 0 : i32
    %c0_i32_1 = arith.constant 0 : i32
    return %c0_i32, %c0_i32_0 : i32, i32
  }
  func.func @transform_7(%arg0: i32, %arg1: i32) -> (i32, i32) {
    %c0_i32 = arith.constant 0 : i32
    %c0_i32_0 = arith.constant 0 : i32
    %c0_i32_1 = arith.constant 0 : i32
    return %c0_i32, %c0_i32_0 : i32, i32
  }
  func.func @transform_8(%arg0: i32, %arg1: i32) -> (i32, i32, i32) {
    %c0_i32 = arith.constant 0 : i32
    %c0_i32_0 = arith.constant 0 : i32
    return %arg0, %c0_i32, %arg1 : i32, i32, i32
  }
}

</mosaic_0001>

<bundles_post_ra>
// kernel: tpu_custom_call.1
= control target key start
LH: loop header
LB: loop body
LE: loop exit
PB: predicated region body
PF: predicated region fallthrough
CT: control target
= control target key end

     0   :  { %s1801_s0 = inlined_call_operand.hbm [shape: f32[2,8,512], index: 0, kind: input, shape index: {}]   ;;  %s1802_s1 = inlined_call_operand.hbm [shape: f32[2,8,512], index: 1, kind: input, shape index: {}]   ;;  %s1803_s2 = inlined_call_operand.hbm [shape: f32[2,8,512], index: 2, kind: input, shape index: {}]   ;;  %s1804_s3 = inlined_call_operand.vmem [shape: f32[2,1,512], index: 3, kind: input, shape index: {}]   ;;  %s1805_s4 = inlined_call_operand.vmem [shape: f32[8,24], index: 4, kind: input, shape index: {}]   ;;  %s1806_s5 = inlined_call_operand.vmem [shape: f32[8,1], index: 5, kind: input, shape index: {}]   ;;  %s1807_s6 = inlined_call_operand.vmem [shape: f32[8,8], index: 6, kind: input, shape index: {}]   ;;  %s1808_s7 = inlined_call_operand.vmem [shape: f32[8,1], index: 7, kind: input, shape index: {}]   ;;  %s1809_s8 = inlined_call_operand.hbm [shape: f32[2,8,512], index: 8, kind: output, shape index: {}]  }
   0x1   :  { %1833 = sst [smem:[#allocation25_spill]] %s1802_s1 }
   0x2   :  { %1834 = sst [smem:[#allocation26_spill]] %s1804_s3 }
   0x3   :  { %1835 = sst [smem:[#allocation27_spill]] %s1805_s4 }
   0x4   :  { %1836 = sst [smem:[#allocation28_spill]] %s1806_s5 }
   0x5   :  { %1837 = sst [smem:[#allocation29_spill]] %s1807_s6 }
   0x6   :  { %1838 = sst [smem:[#allocation30_spill]] %s1808_s7 }
   0x7   :  { %1839 = sst [smem:[#allocation31_spill]] %s1809_s8 }
   0x8   :  { %13 = vsyncpa [#allocation3], 0 }
   0x9   :  { %15 = vsyncpa [#allocation3 + $0x1], 0 }
   0xa   :  { %16 = vsyncpa [#allocation6], 0 }
   0xb   :  { %18 = vsyncpa [#allocation6 + $0x1], 0 }
   0xc   :  { %19 = vsyncpa [#allocation4], 0 }
   0xd   :  { %21 = vsyncpa [#allocation4 + $0x1], 0  ;;  %s1348_s27 = smov 0   ;;  %s1350_s28 = smov 0  }
   0xe   :  { %s1352_s29 = smov 0   ;;  %s1354_s30 = smov 0  }
   0xf   :  { %s1356_s9 = smov 0   ;;  %s1358_s10 = smov 0  }
  0x10   :  { %s1360_s11 = smov 0   ;;  %s1362_s12 = smov 0  }
  0x11   :  { %s1364_s13 = smov 0   ;;  %s1366_s14 = smov 0  }
  0x12   :  { %s1368_s15 = smov 0   ;;  %s1370_s16 = smov 0  }
  0x13   :  { %s1372_s17 = smov 0   ;;  %s1374_s18 = smov 0  }
  0x14 LB: > { %1840 = sst [smem:[#allocation13_spill]] %s1250_s30  ;;  %s1419_s19 = sadd.s32 4294967295, %s1290_s18   ;;  %s1290_s18 = sphi %s1374_s18, %s27_s18   ;;  %s1286_s17 = sphi %s1372_s17, %s1901_s17   ;;  %s1282_s16 = sphi %s1370_s16, %s1912_s16   ;;  %s1278_s15 = sphi %s1368_s15, %s1900_s15   ;;  %s1274_s14 = sphi %s1366_s14, %s1911_s14   ;;  %s1270_s13 = sphi %s1364_s13, %s1910_s13   ;;  %s1266_s12 = sphi %s1362_s12, %s1909_s12   ;;  %s1262_s11 = sphi %s1360_s11, %s1908_s11   ;;  %s1258_s10 = sphi %s1358_s10, %s1907_s10   ;;  %s1254_s9 = sphi %s1356_s9, %s1906_s9   ;;  %s1250_s30 = sphi %s1354_s30, %s1896_s30   ;;  %s1246_s29 = sphi %s1352_s29, %s1905_s29   ;;  %s1242_s28 = sphi %s1350_s28, %s1904_s28   ;;  %s1238_s27 = sphi %s1348_s27, %s1903_s27  }
  0x15   : > { %1841 = sst [smem:[#allocation14_spill]] %s1254_s9  ;;  %s840_s20 = sadd.s32 4294967294, %s1290_s18  }
  0x16   : > { %1842 = sst [smem:[#allocation15_spill]] %s1266_s12  ;;  %s1423_s21 = sadd.s32 1, %s1282_s16 }
  0x17   : > { %1843 = sst [smem:[#allocation16_spill]] %s1274_s14  ;;  %s39_s22 = sadd.s32 1, %s1286_s17 }
  0x18   : > { %1844 = sst [smem:[#allocation17_spill]] %s1278_s15  ;;  %p37_p0 = scmp.ge.s32.totalorder %s1423_s21, 4 }
  0x19   : > { %1845 = sst [smem:[#allocation18_spill]] %s1282_s16  ;;  %p1821_p1 = scmp.eq.s32.totalorder %s1290_s18, 0 }
  0x1a   : > { %1846 = sst [smem:[#allocation19_spill]] %s1286_s17  ;;  %p1820_p2 = scmp.eq.s32.totalorder %s1419_s19, 0 }
  0x1b   : > { %s1431_s24 = scalar_select %p37_p0, 0, %s1423_s21  }
  0x1c   : > { %s1914_s22 = smov (!%p37_p0, %s39_s22), %s1286_s17  ;;  %p89_p3 = scmp.ne.s32.totalorder %s1258_s10, %s1254_s9 }
  0x1d   : > { %p95_p4 = scmp.ne.s32.totalorder %s1254_s9, %s1250_s30  ;;  %p267_p5 = scmp.eq.s32.totalorder %s1419_s19, 7 }
  0x1e   : > { %p1445_p6 = por %p89_p3, %p1821_p1  ;;  %p273_p7 = scmp.eq.s32.totalorder %s840_s20, 7 }
  0x1f   : > { %p1451_p8 = por %p95_p4, %p1820_p2  ;;  %p1455_p9 = por %p267_p5, %p89_p3 }
  0x20   : > { %p1459_p10 = por %p273_p7, %p95_p4  ;;  %p1819_p11 = scmp.lt.s32.totalorder %s1290_s18, 8 }
  0x21   : > { %s1848_s23 = scalar_select %p1451_p8, 1, 0 }
  0x22   : > { %s1850_s25 = scalar_select %p1455_p9, 1, 0 }
  0x23   : > { %1849 = sst [smem:[#allocation20_spill]] %s1848_s23  ;;  %s1465_s8 = sshll.u32 %s1286_s17, 2 }
  0x24   : > { %1851 = sst [smem:[#allocation21_spill]] %s1850_s25  ;;  %s328_s20 = sand.u32 1, %s1290_s18  }
  0x25   : > { %s1852_s30 = scalar_select %p1459_p10, 1, 0 }
  0x26   : > { %s330_s3 = sand.u32 1, %s1258_s10   ;;  %s337_s7 = sadd.s32 %s1282_s16, %s1465_s8 }
  0x27   : > { %1853 = sst [smem:[#allocation22_spill]] %s1852_s30  ;;  %s849_s6 = sshll.u32 %s330_s3, 3 }
  0x28   : > { %s851_s15 = sshll.u32 %s337_s7, 7  ;;  %s332_s4 = scalar_lea.vmem [#allocation5], %s849_s6 }
  0x29   : > { %s341_s5 = sshll.u32 %s332_s4, 4  ;;  %s1854_s1 = sld [smem:[#allocation25_spill]]  ;;  %s1476_s5 = int_to_ptr.vmem [resolvable:$true] %s341_s5 }
  0x2a   : > { %p1482_p12 = pnand %p1819_p11, %p1445_p6  ;;  %s1488_s3 = scalar_lea.sflag [#allocation6], %s328_s20 }
  0x2c   : > { %p1048_p4 = pneg %p1482_p12 }
  0x2f   : > { %s1474_s9 = scalar_lea.hbm %s1854_s1, %s851_s15  ;;  %s1051_s14 = scalar_lea.hbm %s1854_s1, 1024 }
  0x30   : > { %s1046_s4 = scalar_lea.hbm %s1474_s9, 128  ;;  %p1052_p6 = scmp.lt.u32.totalorder %s1474_s9, %s1854_s1 }
  0x31   : > { %p1047_p3 = scmp.ne.s32.totalorder %s1474_s9, %s1046_s4  ;;  %p1053_p11 = scmp.lt.u32.totalorder %s1051_s14, %s1046_s4 }
  0x32   : > { %p1055_p1 = scmp.lt.u32.totalorder %s1046_s4, %s1474_s9 }
  0x33   : > { %p1049_p5 = pnand %p1048_p4, %p1047_p3  ;;  %p1054_p2 = por %p1053_p11, %p1052_p6 }
  0x35   : > { %p1050_p7 = pneg %p1049_p5  ;;  %p1056_p13 = por %p1055_p1, %p1054_p2 }
  0x37   : > { %p1057_p0 = pnand %p1056_p13, %p1050_p7 }
  0x39   : > { %1060 = shalt.err (!%p1057_p0)
}
  0x3a   : > { %s1061_s26 = scalar_lea.vmem %s1476_s5, 128  ;;  %s1292_s20 = smov [#allocation5]  }
  0x3b   : > { %p1062_p3 = scmp.ne.s32.totalorder %s1476_s5, %s1061_s26  ;;  %s1066_s6 = sshll.u32 %s1292_s20, 4  ;;  %s1067_s6 = int_to_ptr.vmem [resolvable:$false] %s1066_s6 }
  0x3c   : > { %s1068_s7 = scalar_lea.vmem %s1067_s6, 256  ;;  %p1069_p9 = scmp.lt.s32.totalorder %s1476_s5, %s1067_s6 }
  0x3d   : > { %p1064_p5 = pnand %p1062_p3, %p1048_p4  ;;  %p1070_p11 = scmp.lt.s32.totalorder %s1068_s7, %s1061_s26 }
  0x3f   : > { %p1065_p10 = pneg %p1064_p5  ;;  %p1071_p6 = por %p1070_p11, %p1069_p9 }
  0x41   : > { %p1072_p1 = pnand %p1071_p6, %p1065_p10 }
  0x43   : > { %1075 = shalt.err (!%p1072_p1)
}
  0x44   : > { %910 = dma.hbm_to_vmem [thread:$0]  (!%p1482_p12), %s1474_s9, 128, %s1476_s5, %s1488_s3  }
  0x45   : > { %p1856_p2 = scmp.lt.s32.totalorder %s1290_s18, 9  ;;  %p1857_p9 = scmp.ge.s32.totalorder %s1290_s18, 1 }
  0x46   : > { %p41_p13 = scmp.ge.s32.totalorder %s1914_s22, 2  ;;  %s841_s4 = sadd.s32 4294967295, %s1282_s16 }
  0x47   : > { %p1520_p10 = pnand %p1857_p9, %p1856_p2  ;;  %s842_s14 = sadd.s32 4294967295, %s1431_s24 }
  0x48   : > { %s1916_s22 = smov (%p41_p13, %s1914_s22), 0  ;;  %p44_p0 = scmp.gt.s32.totalorder %s841_s4, 0 }
  0x49   : > { %s1858_s30 = scalar_select %p1520_p10, 1, 0 }
  0x4a   : > { %1860 = sst [smem:[#allocation24_spill]] %s1916_s22  ;;  %p47_p4 = scmp.gt.s32.totalorder %s842_s14, 0 }
  0x4b   : > { %1859 = sst [smem:[#allocation23_spill]] %s1858_s30  ;;  %s1532_s5 = ssub.s32 %s1286_s17, %s1916_s22 }
  0x4c   : > { %s54_s9 = sadd.s32 1, %s1270_s13  ;;  %s1918_s4 = smov (!%p44_p0, %s841_s4), 0 }
  0x4d   : > { %s1920_s14 = smov (!%p47_p4, %s842_s14), 0  ;;  %p61_p12 = scmp.ne.s32.totalorder %s1270_s13, %s1266_s12 }
  0x4e   : > { %p67_p7 = scmp.ne.s32.totalorder %s1266_s12, %s1262_s11  ;;  %s50_s15 = ssub.s32 %s1918_s4, %s1920_s14 }
  0x4f   : > { %s1861_s23 = ssub.s32 %s1282_s16, %s1431_s24  ;;  %s51_s20 = sor.u32 %s50_s15, %s1532_s5 }
  0x50   : > { %s79_s26 = sor.u32 %s1861_s23, %s1532_s5  ;;  %p1862_p3 = scmp.eq.s32.totalorder %s1290_s18, 0 }
  0x51   : > { %p52_p11 = scmp.eq.s32.totalorder %s51_s20, 0  ;;  %p1864_p6 = scmp.eq.s32.totalorder %s1419_s19, 0 }
  0x52   : > { %p1546_p5 = por %p1862_p3, %p61_p12  ;;  %p80_p2 = scmp.eq.s32.totalorder %s79_s26, 0 }
  0x53   : > { %p1552_p1 = por %p1864_p6, %p67_p7  ;;  %s305_s1 = sand.u32 1, %s1270_s13  }
  0x54   : > { %s1558_s11 = scalar_select %p52_p11, %s1270_s13, %s54_s9  }
  0x55   : > { %s1865_s7 = scalar_select %p1552_p1, 1, 0 }
  0x56   : > { %s1866_s14 = sadd.s32 1, %s1258_s10  ;;  %s845_s15 = sshll.u32 %s305_s1, 3 }
  0x57   : > { %s1563_s23 = scalar_select %p80_p2, %s1258_s10, %s1866_s14  }
  0x58   : > { %s317_s22 = sadd.s32 %s1465_s8, %s1918_s4  ;;  %s309_s16 = scalar_lea.vmem [#allocation2], %s845_s15 }
  0x59   : > { %s848_s17 = sshll.u32 %s317_s22, 7  ;;  %s321_s25 = sshll.u32 %s309_s16, 4  ;;  %s1571_s25 = int_to_ptr.vmem [resolvable:$true] %s321_s25 }
  0x5a   : > { %s1569_s20 = scalar_lea.hbm %s1801_s0, %s848_s17  ;;  %p1867_p9 = scmp.lt.s32.totalorder %s1290_s18, 8 }
  0x5b   : > { %s306_s16 = scalar_lea.sflag [#allocation3], %s305_s1  ;;  %s1076_s22 = scalar_lea.hbm %s1569_s20, 128 }
  0x5c   : > { %p1577_p13 = pnand %p1867_p9, %p1546_p5  ;;  %p1077_p0 = scmp.ne.s32.totalorder %s1569_s20, %s1076_s22 }
  0x5d   : > { %s1081_s30 = scalar_lea.hbm %s1801_s0, 1024  ;;  %p1082_p3 = scmp.lt.u32.totalorder %s1569_s20, %s1801_s0 }
  0x5e   : > { %p1078_p4 = pneg %p1577_p13  ;;  %p1083_p5 = scmp.lt.u32.totalorder %s1081_s30, %s1076_s22 }
  0x5f   : > { %p1085_p6 = scmp.lt.u32.totalorder %s1076_s22, %s1569_s20 }
  0x60   : > { %p1079_p12 = pnand %p1078_p4, %p1077_p0  ;;  %p1084_p11 = por %p1083_p5, %p1082_p3 }
  0x62   : > { %p1080_p7 = pneg %p1079_p12  ;;  %p1086_p2 = por %p1085_p6, %p1084_p11 }
  0x64   : > { %p1087_p9 = pnand %p1086_p2, %p1080_p7 }
  0x66   : > { %1090 = shalt.err (!%p1087_p9)
}
  0x67   : > { %s1091_s1 = scalar_lea.vmem %s1571_s25, 128  ;;  %s1293_s6 = smov [#allocation2]  }
  0x68   : > { %p1092_p0 = scmp.ne.s32.totalorder %s1571_s25, %s1091_s1  ;;  %s1096_s14 = sshll.u32 %s1293_s6, 4  ;;  %s1097_s14 = int_to_ptr.vmem [resolvable:$false] %s1096_s14 }
  0x69   : > { %s1098_s15 = scalar_lea.vmem %s1097_s14, 256  ;;  %p1099_p1 = scmp.lt.s32.totalorder %s1571_s25, %s1097_s14 }
  0x6a   : > { %p1094_p12 = pnand %p1092_p0, %p1078_p4  ;;  %p1100_p3 = scmp.lt.s32.totalorder %s1098_s15, %s1091_s1 }
  0x6c   : > { %p1095_p8 = pneg %p1094_p12  ;;  %p1101_p5 = por %p1100_p3, %p1099_p1 }
  0x6e   : > { %p1102_p11 = pnand %p1101_p5, %p1095_p8 }
  0x70   : > { %1105 = shalt.err (!%p1102_p11)
}
  0x71   : > { %907 = dma.hbm_to_vmem [thread:$0]  (!%p1577_p13), %s1569_s20, 128, %s1571_s25, %s306_s16  }
  0x72   : > { %p106_p8 = scmp.lt.s32.totalorder %s1423_s21, 3  ;;  %s108_s22 = sadd.s32 1, %s1431_s24 }
  0x73   : > { %p109_p1 = scmp.lt.s32.totalorder %s108_s22, 3  ;;  %s116_s9 = sadd.s32 1, %s1246_s29 }
  0x74   : > { %s1922_s21 = smov (!%p106_p8, %s1423_s21), 3  ;;  %p123_p4 = scmp.ne.s32.totalorder %s1246_s29, %s1242_s28 }
  0x75   : > { %s1924_s22 = smov (!%p109_p1, %s108_s22), 3  ;;  %p129_p7 = scmp.ne.s32.totalorder %s1242_s28, %s1238_s27 }
  0x76   : > { %s112_s12 = ssub.s32 %s1922_s21, %s1924_s22  ;;  %s350_s17 = sand.u32 1, %s1246_s29  }
  0x77   : > { %s113_s30 = sor.u32 %s112_s12, %s1532_s5  ;;  %p1869_p6 = scmp.eq.s32.totalorder %s1290_s18, 0 }
  0x78   : > { %p114_p9 = scmp.eq.s32.totalorder %s113_s30, 0  ;;  %p1870_p0 = scmp.eq.s32.totalorder %s1419_s19, 0 }
  0x79   : > { %p125_p2 = por %p123_p4, %p1869_p6  ;;  %s852_s20 = sshll.u32 %s350_s17, 3 }
  0x7a   : > { %p1620_p12 = por %p129_p7, %p1870_p0  ;;  %s360_s16 = sadd.s32 %s1465_s8, %s1922_s21 }
  0x7b   : > { %s1626_s4 = scalar_select %p114_p9, %s1246_s29, %s116_s9  }
  0x7c   : > { %s1871_s25 = scalar_select %p1620_p12, 1, 0 }
  0x7d   : > { %s854_s26 = sshll.u32 %s360_s16, 7  ;;  %s352_s5 = scalar_lea.vmem [#allocation7], %s852_s20 }
  0x7e   : > { %s1631_s27 = scalar_lea.hbm %s1803_s2, %s854_s26  ;;  %s364_s14 = sshll.u32 %s352_s5, 4  ;;  %s1633_s14 = int_to_ptr.vmem [resolvable:$true] %s364_s14 }
  0x7f   : > { %p1872_p13 = scmp.lt.s32.totalorder %s1290_s18, 8  ;;  %s1106_s8 = scalar_lea.hbm %s1631_s27, 128 }
  0x80   : > { %p1107_p5 = scmp.ne.s32.totalorder %s1631_s27, %s1106_s8  ;;  %s1111_s9 = scalar_lea.hbm %s1803_s2, 1024 }
  0x81   : > { %p1637_p3 = pnand %p1872_p13, %p125_p2  ;;  %p1112_p4 = scmp.lt.u32.totalorder %s1631_s27, %s1803_s2 }
  0x82   : > { %p1113_p7 = scmp.lt.u32.totalorder %s1111_s9, %s1106_s8  ;;  %p1115_p2 = scmp.lt.u32.totalorder %s1106_s8, %s1631_s27 }
  0x83   : > { %p1108_p11 = pneg %p1637_p3 }
  0x84   : > { %p1114_p6 = por %p1113_p7, %p1112_p4 }
  0x85   : > { %p1109_p8 = pnand %p1108_p11, %p1107_p5 }
  0x86   : > { %p1116_p9 = por %p1115_p2, %p1114_p6 }
  0x87   : > { %p1110_p1 = pneg %p1109_p8 }
  0x89   : > { %p1117_p0 = pnand %p1116_p9, %p1110_p1 }
  0x8b   : > { %1120 = shalt.err (!%p1117_p0)
}
  0x8c   : > { %s1121_s30 = scalar_lea.vmem %s1633_s14, 128  ;;  %s1294_s20 = smov [#allocation7]  }
  0x8d   : > { %p1122_p13 = scmp.ne.s32.totalorder %s1633_s14, %s1121_s30  ;;  %s1126_s16 = sshll.u32 %s1294_s20, 4  ;;  %s1127_s16 = int_to_ptr.vmem [resolvable:$false] %s1126_s16 }
  0x8e   : > { %s1128_s26 = scalar_lea.vmem %s1127_s16, 256  ;;  %p1129_p12 = scmp.lt.s32.totalorder %s1633_s14, %s1127_s16 }
  0x8f   : > { %p1124_p5 = pnand %p1122_p13, %p1108_p11  ;;  %p1130_p4 = scmp.lt.s32.totalorder %s1128_s26, %s1121_s30 }
  0x91   : > { %p1125_p8 = pneg %p1124_p5  ;;  %p1131_p7 = por %p1130_p4, %p1129_p12 }
  0x93   : > { %p1132_p6 = pnand %p1131_p7, %p1125_p8 }
  0x95   : > { %1135 = shalt.err (!%p1132_p6)
}
  0x96   : > { %913 = dma.hbm_to_vmem [thread:$0]  (!%p1637_p3), %s1631_s27, 128, %s1633_s14, %s1488_s3  }
  0x97   : > { %383 = sbr.rel (%p1520_p10) target bundleno = 753 (0x2f1), region = 52  ;;  %s1875_s6 = sld [smem:[#allocation15_spill]] (!%p1520_p10) }
  0x98   : > { %p1876_p11 = scmp.ne.s32.totalorder (!%p1520_p10), %s1865_s7, 0 }
  0x9d   : > { %s385_s5 = sand.u32 (!%p1520_p10), 1, %s1875_s6  }
  0x9e   : > { %s856_s8 = sshll.u32 %s385_s5, 3  ;;  %s386_s21 = scalar_lea.sflag [#allocation3], %s385_s5 }
  0x9f   : > { %s389_s22 = scalar_lea.vmem [#allocation2], %s856_s8 }
  0xa0   : > { %1221 = dma.done.wait (%p1876_p11), %s386_s21, 128  }
  0xa1   : > { %1223 = vsyncadd (%p1876_p11), %s386_s21, 4294967168  ;;  %s1877_s15 = sld [smem:[#allocation14_spill]]  ;;  %s394_s12 = sand.u32 1, %s1419_s19  }
  0xa2   : > { %s1878_s9 = sld [smem:[#allocation20_spill]]  ;;  %s395_s14 = scalar_lea.sflag [#allocation6], %s394_s12 }
  0xa7   : > { %s396_s3 = sand.u32 1, %s1877_s15  }
  0xa8   : > { %s1678_s27 = sshll.u32 %s396_s3, 3  ;;  %p1879_p10 = scmp.ne.s32.totalorder %s1878_s9, 0 }
  0xa9   : > { %s398_s17 = scalar_lea.vmem [#allocation5], %s1678_s27 }
  0xaa   : > { %1225 = dma.done.wait (%p1879_p10), %s395_s14, 128  }
  0xab   : > { %1227 = vsyncadd (%p1879_p10), %s395_s14, 4294967168  ;;  %s405_s7 = sand.u32 1, %s1242_s28   ;;  %p1880_p12 = scmp.ne.s32.totalorder %s1871_s25, 0 }
  0xac   : > { %s858_s30 = sshll.u32 %s405_s7, 3 }
  0xad   : > { %s407_s20 = scalar_lea.vmem [#allocation7], %s858_s30 }
  0xae   : > { %1229 = dma.done.wait (%p1880_p12), %s395_s14, 128  }
  0xaf   : > { %1231 = vsyncadd (%p1880_p12), %s395_s14, 4294967168  ;;  %v1295_v0 = vmov 0.0|0.0   ;;  %v1296_v1 = vmov 0.0   ;;  %vm1297_vm0 = vmmov 0   ;;  %s1881_s19 = sld [smem:[#allocation16_spill]]  ;;  %v1690_v2 = vld [vmem:[%s398_s17] sm:$0xff]  ;;  %v473_v8 = vlaneseq }
  0xb0   : > { %892 = vmatprep.subr.bf16.mxu0 %v1295_v0  ;;  %887 = vmatprep.subr.mxu1 %v1296_v1  ;;  %v471_v3 = vld [vmem:[%s389_s22] sm:$0xff]  ;;  %s1298_s16 = smov 124   ;;  %v1299_v6 = vmov 0   ;;  %s1882_s1 = sld [smem:[#allocation28_spill]]  ;;  %vm1301_vm3 = vmmov 1   ;;  %vm510_vm7 = vcmask 195584  }
  0xb1   : > { %884 = vmatprep.mubr.msk.f32.mxu0 %vm1297_vm0, %v1296_v1  ;;  %889 = vmatprep.mubr.msk.f32.mxu1 %vm1297_vm0, %v1296_v1  ;;  %v472_v4 = vld [vmem:[%s407_s20] sm:$0xff]  ;;  %v1039_v5 = vpack.i.bf16 %v471_v3, %v1690_v2  ;;  %s1300_s6 = smov 4   ;;  %v474_v9 = vand.u32 127, %v473_v8  ;;  %s1883_s22 = sld [smem:[#allocation27_spill]]  ;;  %vm592_vm8 = vcmask 64512  }
  0xb2   : > { %485 = vrot.lane.b32.xlu1 %v472_v4, %s1298_s16  ;;  %1045 = vset.pattern.permute.xlu0 %v1299_v6  ;;  %s1884_s9 = sld [smem:[#allocation17_spill]]  ;;  %s1885_s17 = sld [smem:[#allocation30_spill]] }
  0xb3   : > { %1044 = vset.pattern.permute.xlu1 %v1299_v6  ;;  %1040 = vrot.lane.b32.xlu0 %v1039_v5, %s1300_s6  ;;  %vm479_vm1 = vcmp.lt.s32.totalorder %v474_v9, 4  ;;  %vm487_vm5 = vcmp.ge.s32.totalorder %v474_v9, 124  ;;  %s1886_s20 = sld [smem:[#allocation29_spill]]  ;;  %s1887_s21 = sld [smem:[#allocation26_spill]] }
  0xb4   : > { %s1888_s14 = sld [smem:[#allocation21_spill]]  ;;  %s456_s7 = scalar_lea.vmem [#allocation8], %s1678_s27 }
  0xb5   : > { %s861_s5 = sshll.u32 %s1881_s19, 7  ;;  %p465_p1 = scmp.lt.s32.totalorder %s1881_s19, 3 }
  0xb6   : > { %v504_v7 = vld [vmem:[%s1882_s1] sm:$0xff]  ;;  %v492_v10 = vstv %s861_s5  ;;  %s692_s30 = sshll.u32 %s456_s7, 4  ;;  %s1302_s27 = smov [#allocation8]   ;;  %s1724_s30 = int_to_ptr.vmem [resolvable:$true] %s692_s30 }
  0xb7   : > { %507 = vperm.xlu1 %1044, %v504_v7   ;;  %483 = vrot.lane.b32.xlu0 %v1690_v2, %s1298_s16  ;;  %v493_v11 = vadd.s32 %v492_v10, %v474_v9  ;;  %v503_v21 = vld [vmem:[%s1883_s22] sm:$0xff]  ;;  %s466_s25 = scalar_select %p465_p1, %s1881_s19, 3 }
  0xb8   : > { %v586_v22 = vld [vmem:[%s1885_s17] sm:$0xff]  ;;  %p463_p3 = scmp.lt.s32.totalorder %s1884_s9, 1  ;;  %s868_s6 = sshll.u32 %s1884_s9, 2 }
  0xb9   : > { %vm494_vm2 = vcmp.ge.s32.totalorder %v493_v11, 4  ;;  %v498_v16 = vadd.s32 4, %v493_v11  ;;  %v585_v28 = vld [vmem:[%s1886_s20] sm:$0xff]  ;;  %s688_s12 = sadd.s32 %s1881_s19, %s868_s6  ;;  %s677_s19 = scalar_lea.sflag [#allocation4], %s396_s3 }
  0xba   : > { %vm894_vm4 = vmpackc.low %vm1301_vm3, %vm494_vm2  ;;  %s464_s16 = scalar_select %p463_p3, %s1884_s9, 1 }
  0xbb   : > { %vm499_vm6 = vcmp.lt.s32.totalorder %v498_v16, 512  ;;  %589 = vperm.xlu0 %1045, %v586_v22   ;;  %s869_s17 = sshll.u32 %s688_s12, 7  ;;  %p1891_p9 = scmp.ne.s32.totalorder %s1888_s14, 0 }
  0xbc   : > { %s860_s26 = sshll.u32 %s464_s16, 2  ;;  %s1889_s16 = sld [smem:[#allocation31_spill]] }
  0xbd   : > { %s468_s1 = sadd.s32 %s860_s26, %s466_s25  ;;  %s1140_s6 = sshll.u32 %s1302_s27, 4  ;;  %s1141_s6 = int_to_ptr.vmem [resolvable:$false] %s1140_s6 }
  0xbe   : > { %s469_s22 = scalar_lea.vmem %s1887_s21, %s468_s1  ;;  %s1136_s1 = scalar_lea.vmem %s1724_s30, 128 }
  0xbf   : > { %v866_v33 = vld [vmem:[%s469_s22] ss:$0 sm:$0xff]  ;;  %p1137_p2 = scmp.ne.s32.totalorder %s1724_s30, %s1136_s1  ;;  %s1142_s5 = scalar_lea.vmem %s1141_s6, 256 }
  0xc0   : > { %p1143_p5 = scmp.lt.s32.totalorder %s1724_s30, %s1141_s6  ;;  %p1144_p8 = scmp.lt.s32.totalorder %s1142_s5, %s1136_s1 }
  0xc1   : > { %p1138_p0 = pnand %p1137_p2, %p1891_p9 }
  0xc2   : > { %s1890_s25 = smov %s1889_s16  ;;  %s1722_s26 = scalar_lea.hbm %s1889_s16, %s869_s17 }
  0xc3   : > { %p1139_p13 = pneg %p1138_p0  ;;  %p1145_p4 = por %p1144_p8, %p1143_p5 }
  0xc5   : > { %p1146_p7 = pnand %p1145_p4, %p1139_p13 }
 0x124   : > { %v486_v18 = vpop.permute.xlu1 %485 }
 0x125   : > { %v1041_v12 = vpop.permute.xlu0 %1040 }
 0x126   : > { %v1043_v13 = vunpack.i.h.bf16 %v1041_v12  ;;  %v1042_v14 = vunpack.i.l.bf16 %v1041_v12 }
 0x128   : > { %v482_v15 = vsel %vm479_vm1, %v1043_v13, %v1042_v14 }
 0x129   : > { %v893_v17 = vpack.c.bf16 %v1690_v2, %v482_v15  ;;  %v484_v19 = vpop.permute.xlu0 %483 }
 0x12a   : > { %v490_v20 = vsel %vm487_vm5, %v486_v18, %v484_v19 }
 0x12b   : > { %895 = vmatpush3.bf16.msk.msra.mxu0 %vm894_vm4, %v893_v17 }
 0x12c   : > { %882 = vmatprep.subr.mxu0 %v1296_v1 }
 0x12f   : > { %883 = vmatpush3.msk.msra.mxu0 %vm499_vm6, %v490_v20 }
 0x130   : > { %885 = vmatmul.mubr.msk.f32.vlgmr.msra.gmra.mrb[0].mxu0 %vm510_vm7, %v503_v21 }
 0x136   : > { %v508_v23 = vpop.permute.xlu1 %507 }
 0x13a   : > { %v590_v29 = vpop.permute.xlu0 %589 }
 0x203   : > { %v580_v24 = vpop.f32.mrb[0].mxu0 }
 0x204   : > { %v581_v25 = vadd.f32 %v580_v24, %v508_v23  ;;  %v886_v26 = vpop.f32.mrb[1].mxu0 }
 0x206   : > { %v584_v27 = vmax.f32 %v581_v25, 0.0 }
 0x208   : > { %888 = vmatpush3.msra.mxu1 %v584_v27 }
 0x209   : > { %890 = vmatmul.mubr.msk.f32.vlgmr.msra.gmra.mrb[0].mxu1 %vm592_vm8, %v585_v28 }
 0x2dc   : > { %v662_v30 = vpop.f32.mrb[0].mxu1 }
 0x2dd   : > { %v663_v31 = vadd.f32 %v662_v30, %v590_v29  ;;  %v891_v32 = vpop.f32.mrb[1].mxu1 }
 0x2df   : > { %v666_v34 = vadd.f32 %v663_v31, %v1690_v2 }
 0x2e1   : > { %v674_v35 = vmul.f32 %v866_v33, %v666_v34 }
 0x2e3   : > { %675 = vst [vmem:[%s456_s7] sm:$0xff] %v674_v35 }
 0x2e4   : > { %1149 = shalt.err (!%p1146_p7)
}
 0x2e5   : > { %s1150_s15 = scalar_lea.hbm %s1722_s26, 128  ;;  %s1154_s21 = scalar_lea.hbm %s1890_s25, 1024 }
 0x2e6   : > { %p1151_p6 = scmp.ne.s32.totalorder %s1722_s26, %s1150_s15  ;;  %p1155_p12 = scmp.lt.u32.totalorder %s1722_s26, %s1890_s25 }
 0x2e7   : > { %p1156_p3 = scmp.lt.u32.totalorder %s1154_s21, %s1150_s15  ;;  %p1158_p2 = scmp.lt.u32.totalorder %s1150_s15, %s1722_s26 }
 0x2e8   : > { %p1152_p11 = pnand %p1151_p6, %p1891_p9 }
 0x2e9   : > { %p1157_p1 = por %p1156_p3, %p1155_p12 }
 0x2ea   : > { %p1153_p10 = pneg %p1152_p11 }
 0x2eb   : > { %p1159_p0 = por %p1158_p2, %p1157_p1 }
 0x2ed   : > { %p1160_p13 = pnand %p1159_p0, %p1153_p10 }
 0x2ef   : > { %1163 = shalt.err (!%p1160_p13)
}
 0x2f0   : > { %902 = dma.vmem_to_hbm [thread:$0]  (%p1891_p9), %s1724_s30, 128, %s1722_s26, %s677_s19  }
 0x2f1 PF: > { %s1892_s17 = sld [smem:[#allocation13_spill]]  ;;  %s1893_s7 = sld [smem:[#allocation22_spill]] }
 0x2f2   : > { %p919_p5 = scmp.ge.s32.totalorder %s1290_s18, 2 }
 0x2f7   : > { %s704_s20 = sand.u32 1, %s1892_s17   ;;  %p1894_p8 = scmp.ne.s32.totalorder %s1893_s7, 0 }
 0x2f8   : > { %s705_s9 = scalar_lea.sflag [#allocation4], %s704_s20 }
 0x2f9   : > { %p915_p4 = pnand %p919_p5, %p1894_p8 }
 0x2fb   : > { %1233 = dma.done.wait (!%p915_p4), %s705_s9, 128  }
 0x2fc   : > { %1235 = vsyncadd (!%p915_p4), %s705_s9, 4294967168  ;;  %s27_s18 = sadd.s32 1, %s1290_s18   ;;  %s1896_s30 = sld [smem:[#allocation14_spill]] }
 0x2fd   : > { %p1754_p7 = scmp.ge.s32.totalorder %s27_s18, 10   ;;  %s1897_s14 = sld [smem:[#allocation15_spill]] }
 0x2fe   : > { %s1898_s26 = smov %s1558_s11  ;;  %s1899_s19 = sld [smem:[#allocation18_spill]] }
 0x2ff   : > { %s1900_s15 = sld [smem:[#allocation19_spill]]  ;;  %s1901_s17 = sld [smem:[#allocation24_spill]] }
 0x300   : > { %s1903_s27 = smov %s1242_s28  ;;  %s1904_s28 = smov %s1246_s29 }
 0x301   : > { %s1905_s29 = smov %s1626_s4  ;;  %s1906_s9 = smov %s1258_s10 }
 0x302   : > { %s1907_s10 = smov %s1563_s23  ;;  %s1909_s12 = smov %s1270_s13 }
 0x303   : > { %s1908_s11 = smov %s1897_s14  ;;  %s1910_s13 = smov %s1898_s26 }
 0x304   : > { %s1911_s14 = smov %s1899_s19  ;;  %s1912_s16 = smov %s1431_s24 }
 0x305   :  { %26 = sbr.rel (!%p1754_p7) target bundleno = 20 (0x14), region = 124 }
 0x30c   :  { %710 = vsyncpa [#allocation3], 1 }
 0x30d   :  { %712 = vsyncpa [#allocation3 + $0x1], 1 }
 0x30e   :  { %713 = vsyncpa [#allocation6], 1 }
 0x30f   :  { %715 = vsyncpa [#allocation6 + $0x1], 1 }
 0x310   :  { %716 = vsyncpa [#allocation4], 1 }
 0x311   :  { %718 = vsyncpa [#allocation4 + $0x1], 1 }

</bundles_post_ra>
